<compile_context>
chip_gen: v7x
topology: tpu7x:2x2x1
jax: 0.10.0
libtpu: 0.0.40
codegen_flags: <defaults>
</compile_context>

<pallas_src>
import jax
import jax.numpy as jnp
from jax.experimental import pallas as pl
from jax.experimental.pallas import tpu as pltpu

_LANES = 128                            # lane width of one vreg
_MAX_BLOCK_BYTES = 4 * 1024 * 1024      # per-block VMEM budget
_VMEM_LIMIT_BYTES = 32 * 1024 * 1024    # raise v5e's 16 MiB scoped default


def _sublanes_for(dtype):
    # Sublane packing: 32-bit -> 8, 16-bit -> 16, 8-bit -> 32.
    return {4: 8, 2: 16, 1: 32}.get(jnp.dtype(dtype).itemsize, 8)


def _round_up(v, m):
    return ((v + m - 1) // m) * m


def _mish_kernel(x_ref, o_ref):
    # x_ref / o_ref: (tile_rows, 128) tiles in VMEM, native dtype.
    x = x_ref[...].astype(jnp.float32)
    # n = exp(-|x|): single EUP transcendental, never overflows.
    n = jnp.exp(-jnp.abs(x))
    n2 = n * n
    pos = x >= 0.0
    # tanh(softplus(x)) as an exact rational function of n = exp(-|x|).
    num = jnp.where(pos, 1.0 + 2.0 * n, 2.0 * n + n2)
    den = jnp.where(pos, 1.0 + 2.0 * n + 2.0 * n2, 2.0 + 2.0 * n + n2)
    t = num * pl.reciprocal(den, approx=False)
    o_ref[...] = (x * t).astype(o_ref.dtype)


@jax.jit
def mish(x):
    """Elementwise Mish for an arbitrary-shaped array via a Pallas TPU kernel."""
    orig_shape = x.shape
    orig_dtype = x.dtype

    # Stream the native floating dtype through the kernel; non-floating inputs
    # fall back to f32.
    compute_dtype = orig_dtype if jnp.issubdtype(orig_dtype, jnp.floating) \
        else jnp.float32

    flat = x.reshape(-1).astype(compute_dtype)
    n = flat.shape[0]

    sublane = _sublanes_for(compute_dtype)
    rows = _round_up(pl.cdiv(n, _LANES), sublane)
    padded = rows * _LANES

    # Only pad / slice when the size genuinely requires it (no extra HBM
    # round-trips on the common path).
    needs_pad = padded != n
    if needs_pad:
        flat = jnp.pad(flat, (0, padded - n))
    x2d = flat.reshape(rows, _LANES)

    # Tile selection: blocks of at most _MAX_BLOCK_BYTES, and at least 2 grid
    # steps whenever there is more than one sublane-tile of rows so both v7x
    # TensorCores get work. Ragged last blocks are handled by Pallas.
    itemsize = jnp.dtype(compute_dtype).itemsize
    max_tile_rows = max(sublane, _MAX_BLOCK_BYTES // (_LANES * itemsize))
    min_steps = pl.cdiv(rows, max_tile_rows)
    if rows >= 2 * sublane:
        min_steps = max(min_steps, 2)
    tile_rows = min(rows, _round_up(pl.cdiv(rows, min_steps), sublane))
    grid = (pl.cdiv(rows, tile_rows),)

    out2d = pl.pallas_call(
        _mish_kernel,
        out_shape=jax.ShapeDtypeStruct((rows, _LANES), compute_dtype),
        grid=grid,
        in_specs=[pl.BlockSpec((tile_rows, _LANES), lambda i: (i, 0))],
        out_specs=pl.BlockSpec((tile_rows, _LANES), lambda i: (i, 0)),
        compiler_params=pltpu.CompilerParams(
            dimension_semantics=("parallel",),
            vmem_limit_bytes=_VMEM_LIMIT_BYTES),
    )(x2d)

    if needs_pad:
        out = out2d.reshape(-1)[:n].reshape(orig_shape)
    else:
        out = out2d.reshape(orig_shape)
    return out.astype(orig_dtype)


def _mish_reference(x):
    xf = x.astype(jnp.float32)
    return (xf * jnp.tanh(jax.nn.softplus(xf))).astype(x.dtype)


if __name__ == "__main__":
    key = jax.random.PRNGKey(0)
    k1, k2, k3 = jax.random.split(key, 3)

    # Main check: f32, exact multiple of the tile (no pad path), 2-step grid.
    x = 3.0 * jax.random.normal(k1, (2, 4, 16, 16), dtype=jnp.float32)
    out = jax.block_until_ready(mish(x))
    ref = _mish_reference(x)
    assert out.shape == x.shape and out.dtype == x.dtype
    assert jnp.allclose(out, ref, atol=1e-5, rtol=1e-5), \
        float(jnp.max(jnp.abs(out - ref)))

    # Ragged size: exercises the pad/slice fallback path.
    x_odd = 3.0 * jax.random.normal(k2, (3, 5, 7), dtype=jnp.float32)
    out_odd = jax.block_until_ready(mish(x_odd))
    ref_odd = _mish_reference(x_odd)
    assert out_odd.shape == x_odd.shape
    assert jnp.allclose(out_odd, ref_odd, atol=1e-5, rtol=1e-5)

    # Native-bf16 path: kernel streams bf16, computes in f32, stores bf16.
    x_bf = (3.0 * jax.random.normal(k3, (2, 4, 16, 16),
                                    dtype=jnp.float32)).astype(jnp.bfloat16)
    out_bf = jax.block_until_ready(mish(x_bf))
    ref_bf = _mish_reference(x_bf)
    assert out_bf.dtype == jnp.bfloat16
    assert jnp.allclose(out_bf.astype(jnp.float32), ref_bf.astype(jnp.float32),
                        atol=0.1, rtol=0.02)

    print("KERNEL_OK")
</pallas_src>

<mosaic_0001>
module attributes {stable_mosaic.version = 11 : i64} {
  func.func @_mish_kernel(%arg0: i32, %arg1: memref<8x128xf32, #tpu.memory_space<vmem>>, %arg2: memref<8x128xf32, #tpu.memory_space<vmem>>) attributes {dimension_semantics = [#tpu.dimension_semantics<parallel>], iteration_bounds = array<i64: 2>, scalar_prefetch = 0 : i64, scratch_operands = 0 : i64, tpu.core_type = #tpu.core_type<tc>, window_params = [{transform_indices = @transform_0, window_bounds = array<i64: 8, 128>}, {transform_indices = @transform_1, window_bounds = array<i64: 8, 128>}]} {
    %c0 = arith.constant 0 : index
    %c0_0 = arith.constant 0 : index
    %0 = vector.load %arg1[%c0, %c0_0] : memref<8x128xf32, #tpu.memory_space<vmem>>, vector<8x128xf32>
    %1 = math.absf %0 : vector<8x128xf32>
    %cst = arith.constant 0.000000e+00 : f32
    %2 = vector.broadcast %cst : f32 to vector<8x128xf32>
    %3 = arith.subf %2, %1 : vector<8x128xf32>
    %4 = math.exp %3 : vector<8x128xf32>
    %5 = arith.mulf %4, %4 : vector<8x128xf32>
    %cst_1 = arith.constant 0.000000e+00 : f32
    %6 = vector.broadcast %cst_1 : f32 to vector<8x128xf32>
    %7 = arith.cmpf oge, %0, %6 : vector<8x128xf32>
    %cst_2 = arith.constant 2.000000e+00 : f32
    %8 = vector.broadcast %cst_2 : f32 to vector<8x128xf32>
    %9 = arith.mulf %8, %4 : vector<8x128xf32>
    %cst_3 = arith.constant 1.000000e+00 : f32
    %10 = vector.broadcast %cst_3 : f32 to vector<8x128xf32>
    %11 = arith.addf %10, %9 : vector<8x128xf32>
    %cst_4 = arith.constant 2.000000e+00 : f32
    %12 = vector.broadcast %cst_4 : f32 to vector<8x128xf32>
    %13 = arith.mulf %12, %4 : vector<8x128xf32>
    %14 = arith.addf %13, %5 : vector<8x128xf32>
    %15 = arith.select %7, %11, %14 : vector<8x128xi1>, vector<8x128xf32>
    %cst_5 = arith.constant 2.000000e+00 : f32
    %16 = vector.broadcast %cst_5 : f32 to vector<8x128xf32>
    %17 = arith.mulf %16, %4 : vector<8x128xf32>
    %cst_6 = arith.constant 1.000000e+00 : f32
    %18 = vector.broadcast %cst_6 : f32 to vector<8x128xf32>
    %19 = arith.addf %18, %17 : vector<8x128xf32>
    %cst_7 = arith.constant 2.000000e+00 : f32
    %20 = vector.broadcast %cst_7 : f32 to vector<8x128xf32>
    %21 = arith.mulf %20, %5 : vector<8x128xf32>
    %22 = arith.addf %19, %21 : vector<8x128xf32>
    %cst_8 = arith.constant 2.000000e+00 : f32
    %23 = vector.broadcast %cst_8 : f32 to vector<8x128xf32>
    %24 = arith.mulf %23, %4 : vector<8x128xf32>
    %cst_9 = arith.constant 2.000000e+00 : f32
    %25 = vector.broadcast %cst_9 : f32 to vector<8x128xf32>
    %26 = arith.addf %25, %24 : vector<8x128xf32>
    %27 = arith.addf %26, %5 : vector<8x128xf32>
    %28 = arith.select %7, %22, %27 : vector<8x128xi1>, vector<8x128xf32>
    %29 = tpu.reciprocal %28 : vector<8x128xf32> -> vector<8x128xf32>
    %30 = arith.mulf %15, %29 : vector<8x128xf32>
    %31 = arith.mulf %0, %30 : vector<8x128xf32>
    %c0_10 = arith.constant 0 : index
    %c0_11 = arith.constant 0 : index
    %32 = vector.load %arg2[%c0_10, %c0_11] : memref<8x128xf32, #tpu.memory_space<vmem>>, vector<8x128xf32>
    tpu.vector_store %arg2[%c0_10, %c0_11], %31 {strides = array<i32>} : memref<8x128xf32, #tpu.memory_space<vmem>>, vector<8x128xf32>,
    return
  }
  func.func @transform_0(%arg0: i32) -> (i32, i32) {
    %c0_i32 = arith.constant 0 : i32
    %c0_i32_0 = arith.constant 0 : i32
    return %arg0, %c0_i32 : i32, i32
  }
  func.func @transform_1(%arg0: i32) -> (i32, i32) {
    %c0_i32 = arith.constant 0 : i32
    %c0_i32_0 = arith.constant 0 : i32
    return %arg0, %c0_i32 : i32, i32
  }
}

</mosaic_0001>

<bundles_post_ra>
// kernel: mish.1
= control target key start
LH: loop header
LB: loop body
LE: loop exit
PB: predicated region body
PF: predicated region fallthrough
CT: control target
= control target key end

     0   :  { %s224_s6 = smov 0   ;;  %s241_s0 = inlined_call_operand.vmem [shape: f32[16,128], index: 0, kind: input, shape index: {}]   ;;  %s242_s1 = inlined_call_operand.vmem [shape: f32[16,128], index: 1, kind: output, shape index: {}]  }
   0x1 LB: > { %s185_s7 = sadd.s32 4294967295, %s212_s6   ;;  %p189_p0 = scmp.ge.s32.totalorder %s212_s6, 1  ;;  %s212_s6 = sphi %s224_s6, %s11_s6  }
   0x2   : > { %p86_p1 = scmp.lt.s32.totalorder %s212_s6, 3 }
   0x4   : > { %p87_p2 = pnand %p189_p0, %p86_p1 }
   0x5   : > { %p104_p3 = scmp.lt.s32.totalorder (!%p87_p2), %s185_s7, 1 }
   0x6   : > { %90 = sbr.rel (%p87_p2) target bundleno = 57 (0x39), region = 24 }
   0xd   : > { %s244_s7 = smov (!%p104_p3, %s185_s7), 1 }
   0xe   : > { %s190_s8 = sshll.u32 %s244_s7, 3 }
   0xf   : > { %s107_s11 = scalar_lea.vmem %s241_s0, %s190_s8  ;;  %s111_s14 = scalar_lea.vmem %s242_s1, %s190_s8 }
  0x10   : > { %v112_v0 = vld [vmem:[%s107_s11] sm:$0xff] }
  0x11   : > { %v113_v1 = vand.u32 2147483647, %v112_v0  ;;  %vm118_vm0 = vcmp.ge.f32.partialorder %v112_v0, 0.0 }
  0x13   : > { %v114_v2 = vsub.f32 0.0, %v113_v1 }
  0x15   : > { %v115_v3 = vmul.f32 1.442695, %v114_v2 }
  0x17   : > { %202 = vpow2.f32 %v115_v3 }
  0x21   : > { %v203_v4 = vpop.eup %202 }
  0x22   : > { %v117_v5 = vmul.f32 %v203_v4, %v203_v4  ;;  %v119_v6 = vmul.f32 2.0, %v203_v4 }
  0x24   : > { %v120_v7 = vadd.f32 1.0, %v119_v6  ;;  %v123_v8 = vmul.f32 2.0, %v117_v5  ;;  %v125_v9 = vadd.f32 2.0, %v119_v6  ;;  %v121_v13 = vadd.f32 %v119_v6, %v117_v5 }
  0x26   : > { %v124_v10 = vadd.f32 %v123_v8, %v120_v7  ;;  %v126_v11 = vadd.f32 %v125_v9, %v117_v5  ;;  %v122_v14 = vsel %vm118_vm0, %v120_v7, %v121_v13 }
  0x28   : > { %v127_v12 = vsel %vm118_vm0, %v124_v10, %v126_v11 }
  0x29   : > { %204 = vrcp.f32 %v127_v12 }
  0x33   : > { %v205_v15 = vpop.eup %204 }
  0x34   : > { %v129_v16 = vmul.f32 %v205_v15, %v122_v14 }
  0x36   : > { %v130_v17 = vmul.f32 %v129_v16, %v112_v0 }
  0x38   : > { %131 = vst [vmem:[%s111_s14] sm:$0xff] %v130_v17 }
  0x39 PF: > { %s11_s6 = sadd.s32 1, %s212_s6  }
  0x3a   : > { %p8_p4 = scmp.ge.s32.totalorder %s11_s6, 4  }
  0x3c   :  { %10 = sbr.rel (!%p8_p4) target bundleno = 1 (0x1), region = 54 }

</bundles_post_ra>
